<compile_context>
chip_gen: v7x
topology: tpu7x:2x2x1
jax: 0.10.0
libtpu: 0.0.40
codegen_flags: <defaults>
</compile_context>

<pallas_src>
import jax
import jax.numpy as jnp
from jax.experimental import pallas as pl


def self_attention_kernel(k_ref, v_ref, q0_ref, wk_ref, wv_ref, wq_ref, b_ref,
                          m1_ref, m2_ref, wfc_ref, bfc_ref, out_ref):
    """Whole batch in one grid step; everything stays in VMEM.

    k_ref, v_ref : (B*S, D)  key / value inputs, batch-major rows
    q0_ref       : (B, D)    query at sequence position 0 only
    wk/wv/wq_ref : (D, H)    dense projection weights (no zero padding)
    b_ref        : (3, H)    rows = [bq, bk, bv]
    m1_ref       : (H, nh)   head one-hot over lanes, pre-scaled by 1/sqrt(hd)
    m2_ref       : (nh, H)   head one-hot (unscaled) -> broadcasts attn to V lanes
    wfc_ref      : (H, H)    original fc weight
    bfc_ref      : (1, H)
    out_ref      : (B, H)    lane-dense output slab
    """
    B, H = out_ref.shape
    S = k_ref.shape[0] // B
    nh = m1_ref.shape[1]
    f32 = jnp.float32

    bq = b_ref[0:1, :]
    bk = b_ref[1:2, :]
    bv = b_ref[2:3, :]

    # Tall dense projections: one (B*S, D) @ (D, H) MXU pass each.
    K = (jnp.dot(k_ref[...], wk_ref[...], preferred_element_type=f32) + bk
         ).reshape(B, S, H)
    V = (jnp.dot(v_ref[...], wv_ref[...], preferred_element_type=f32) + bv
         ).reshape(B, S, H)
    Q0 = (jnp.dot(q0_ref[...], wq_ref[...], preferred_element_type=f32) + bq
          ).reshape(B, 1, H)

    # Per-head scores via the scaled head one-hot matmul: (B, S, nh).
    prod = (K * Q0).reshape(B * S, H)
    e = jnp.dot(prod, m1_ref[...], preferred_element_type=f32).reshape(B, S, nh)

    # Softmax over keys (axis 1), max-stabilized; EUP reciprocal + Newton step.
    m = jnp.max(e, axis=1, keepdims=True)                  # (B, 1, nh)
    p = jnp.exp(e - m)                                     # (B, S, nh)
    l = jnp.sum(p, axis=1, keepdims=True)                  # (B, 1, nh)
    r = pl.reciprocal(l, approx=True)
    r = r * (2.0 - l * r)                                  # refine to ~f32
    attn = (p * r).reshape(B * S, nh)                      # (B*S, nh)

    # Broadcast attention weights onto each head's V lanes, reduce over keys.
    a_exp = jnp.dot(attn, m2_ref[...],
                    preferred_element_type=f32).reshape(B, S, H)   # (B, S, H)
    ctx = jnp.sum(a_exp * V, axis=1)                       # (B, H)

    # Final fc: one lane-dense (B, H) @ (H, H) matmul + broadcast bias.
    out_ref[...] = (jnp.dot(ctx, wfc_ref[...], preferred_element_type=f32)
                    + bfc_ref[...])


def self_attention(q, k, v, params, n_heads):
    B, S, D = q.shape
    H = params["wq"].shape[1]
    hd = H // n_heads
    inv_scale = float(hd) ** -0.5
    f32 = jnp.float32

    # ---- wrapper-side packing (layout plumbing only, no zero padding) --------
    k2d = k.reshape(B * S, D)                                     # (B*S, D)
    v2d = v.reshape(B * S, D)                                     # (B*S, D)
    q0 = q[:, 0, :]                                               # (B, D)

    # Packed bias table: rows = [bq, bk, bv].
    b_pack = jnp.concatenate([params["bq"], params["bk"], params["bv"]],
                             axis=0).astype(f32)                  # (3, H)

    # Head one-hot mask matrices (replace per-head lane slicing with matmuls).
    head_of_lane = jnp.arange(H, dtype=jnp.int32) // hd           # (H,)
    onehot = (head_of_lane[:, None] ==
              jnp.arange(n_heads, dtype=jnp.int32)[None, :]).astype(f32)  # (H, nh)
    m1 = onehot * inv_scale                                       # (H, nh)
    m2 = onehot.T                                                 # (nh, H)

    out = pl.pallas_call(
        self_attention_kernel,
        out_shape=jax.ShapeDtypeStruct((B, H), f32),
        grid=(1,),
        in_specs=[
            pl.BlockSpec((B * S, D), lambda i: (0, 0)),
            pl.BlockSpec((B * S, D), lambda i: (0, 0)),
            pl.BlockSpec((B, D), lambda i: (0, 0)),
            pl.BlockSpec((D, H), lambda i: (0, 0)),
            pl.BlockSpec((D, H), lambda i: (0, 0)),
            pl.BlockSpec((D, H), lambda i: (0, 0)),
            pl.BlockSpec((3, H), lambda i: (0, 0)),
            pl.BlockSpec((H, n_heads), lambda i: (0, 0)),
            pl.BlockSpec((n_heads, H), lambda i: (0, 0)),
            pl.BlockSpec((H, H), lambda i: (0, 0)),
            pl.BlockSpec((1, H), lambda i: (0, 0)),
        ],
        out_specs=pl.BlockSpec((B, H), lambda i: (0, 0)),
    )(k2d, v2d, q0, params["wk"], params["wv"], params["wq"], b_pack,
      m1, m2, params["wfc"], params["bfc"])
    return out


def self_attention_ref(q, k, v, params, n_heads):
    """Pure-JAX reference mirroring the PyTorch forward exactly."""
    B, S, _ = q.shape
    H = params["wq"].shape[1]
    hd = H // n_heads
    Q = q @ params["wq"] + params["bq"]
    K = k @ params["wk"] + params["bk"]
    V = v @ params["wv"] + params["bv"]

    def split(x):
        return x.reshape(B, S, n_heads, hd).transpose(0, 2, 1, 3)  # (B, nh, S, hd)

    Q, K, V = split(Q), split(K), split(V)
    energy = jnp.einsum("bhqd,bhkd->bhqk", Q, K) / jnp.sqrt(jnp.float32(hd))
    attn = jax.nn.softmax(energy, axis=-1)
    x = jnp.einsum("bhqk,bhkd->bhqd", attn, V)
    x = x.transpose(0, 2, 1, 3).reshape(B, S, H)[:, 0, :]
    return x @ params["wfc"] + params["bfc"]


def init_params(key, s_dim, hid_dim):
    ks = jax.random.split(key, 8)

    def lin(kw, kb, fan_in, fan_out):
        bound = 1.0 / (fan_in ** 0.5)
        w = jax.random.uniform(kw, (fan_in, fan_out), jnp.float32, -bound, bound)
        b = jax.random.uniform(kb, (1, fan_out), jnp.float32, -bound, bound)
        return w, b

    wq, bq = lin(ks[0], ks[1], s_dim, hid_dim)
    wk, bk = lin(ks[2], ks[3], s_dim, hid_dim)
    wv, bv = lin(ks[4], ks[5], s_dim, hid_dim)
    wfc, bfc = lin(ks[6], ks[7], hid_dim, hid_dim)
    return {"wq": wq, "bq": bq, "wk": wk, "bk": bk,
            "wv": wv, "bv": bv, "wfc": wfc, "bfc": bfc}


if __name__ == "__main__":
    bsz, seq, s_dim, hid_dim, n_heads = 2, 8, 32, 32, 4

    key = jax.random.PRNGKey(0)
    kp, kq, kk, kv = jax.random.split(key, 4)
    params = init_params(kp, s_dim, hid_dim)
    query = jax.random.normal(kq, (bsz, seq, s_dim), jnp.float32)
    key_t = jax.random.normal(kk, (bsz, seq, s_dim), jnp.float32)
    value = jax.random.normal(kv, (bsz, seq, s_dim), jnp.float32)

    out = jax.block_until_ready(self_attention(query, key_t, value, params, n_heads))
    ref = self_attention_ref(query, key_t, value, params, n_heads)

    assert out.shape == (bsz, hid_dim)
    assert jnp.allclose(out, ref, rtol=1e-4, atol=1e-4), "mismatch vs reference"
    print("KERNEL_OK")
</pallas_src>

<mosaic_0001>
module attributes {stable_mosaic.version = 11 : i64} {
  func.func @self_attention_kernel(%arg0: i32, %arg1: memref<16x32xf32, #tpu.memory_space<vmem>>, %arg2: memref<16x32xf32, #tpu.memory_space<vmem>>, %arg3: memref<2x32xf32, #tpu.memory_space<vmem>>, %arg4: memref<32x32xf32, #tpu.memory_space<vmem>>, %arg5: memref<32x32xf32, #tpu.memory_space<vmem>>, %arg6: memref<32x32xf32, #tpu.memory_space<vmem>>, %arg7: memref<3x32xf32, #tpu.memory_space<vmem>>, %arg8: memref<32x4xf32, #tpu.memory_space<vmem>>, %arg9: memref<4x32xf32, #tpu.memory_space<vmem>>, %arg10: memref<32x32xf32, #tpu.memory_space<vmem>>, %arg11: memref<1x32xf32, #tpu.memory_space<vmem>>, %arg12: memref<2x32xf32, #tpu.memory_space<vmem>>) attributes {dimension_semantics = [#tpu.dimension_semantics<arbitrary>], iteration_bounds = array<i64: 1>, scalar_prefetch = 0 : i64, scratch_operands = 0 : i64, tpu.core_type = #tpu.core_type<tc>, window_params = [{pipeline_mode = #tpu.pipeline_mode<synchronous>, transform_indices = @transform_0, window_bounds = array<i64: 16, 32>}, {pipeline_mode = #tpu.pipeline_mode<synchronous>, transform_indices = @transform_1, window_bounds = array<i64: 16, 32>}, {pipeline_mode = #tpu.pipeline_mode<synchronous>, transform_indices = @transform_2, window_bounds = array<i64: 2, 32>}, {pipeline_mode = #tpu.pipeline_mode<synchronous>, transform_indices = @transform_3, window_bounds = array<i64: 32, 32>}, {pipeline_mode = #tpu.pipeline_mode<synchronous>, transform_indices = @transform_4, window_bounds = array<i64: 32, 32>}, {pipeline_mode = #tpu.pipeline_mode<synchronous>, transform_indices = @transform_5, window_bounds = array<i64: 32, 32>}, {pipeline_mode = #tpu.pipeline_mode<synchronous>, transform_indices = @transform_6, window_bounds = array<i64: 3, 32>}, {pipeline_mode = #tpu.pipeline_mode<synchronous>, transform_indices = @transform_7, window_bounds = array<i64: 32, 4>}, {pipeline_mode = #tpu.pipeline_mode<synchronous>, transform_indices = @transform_8, window_bounds = array<i64: 4, 32>}, {pipeline_mode = #tpu.pipeline_mode<synchronous>, transform_indices = @transform_9, window_bounds = array<i64: 32, 32>}, {pipeline_mode = #tpu.pipeline_mode<synchronous>, transform_indices = @transform_10, window_bounds = array<i64: 1, 32>}, {pipeline_mode = #tpu.pipeline_mode<synchronous>, transform_indices = @transform_11, window_bounds = array<i64: 2, 32>}]} {
    %c0 = arith.constant 0 : index
    %c0_0 = arith.constant 0 : index
    %0 = vector.load %arg7[%c0, %c0_0] : memref<3x32xf32, #tpu.memory_space<vmem>>, vector<1x32xf32>
    %c1 = arith.constant 1 : index
    %c0_1 = arith.constant 0 : index
    %1 = vector.load %arg7[%c1, %c0_1] : memref<3x32xf32, #tpu.memory_space<vmem>>, vector<1x32xf32>
    %c2 = arith.constant 2 : index
    %c0_2 = arith.constant 0 : index
    %2 = vector.load %arg7[%c2, %c0_2] : memref<3x32xf32, #tpu.memory_space<vmem>>, vector<1x32xf32>
    %c0_3 = arith.constant 0 : index
    %c0_4 = arith.constant 0 : index
    %3 = vector.load %arg1[%c0_3, %c0_4] : memref<16x32xf32, #tpu.memory_space<vmem>>, vector<16x32xf32>
    %c0_5 = arith.constant 0 : index
    %c0_6 = arith.constant 0 : index
    %4 = vector.load %arg4[%c0_5, %c0_6] : memref<32x32xf32, #tpu.memory_space<vmem>>, vector<32x32xf32>
    %cst = arith.constant dense<0.000000e+00> : vector<16x32xf32>
    %5 = tpu.matmul %3, %4, %cst {dimension_numbers = #tpu.dot_dimension_numbers<[1], [0], [0], [1], [0, 0, 1, 1], [], []>} : vector<16x32xf32>, vector<32x32xf32>, vector<16x32xf32> -> vector<16x32xf32>
    %6 = vector.broadcast %1 : vector<1x32xf32> to vector<16x32xf32>
    %7 = arith.addf %5, %6 : vector<16x32xf32>
    %8 = vector.shape_cast %7 : vector<16x32xf32> to vector<2x8x32xf32>
    %c0_7 = arith.constant 0 : index
    %c0_8 = arith.constant 0 : index
    %9 = vector.load %arg2[%c0_7, %c0_8] : memref<16x32xf32, #tpu.memory_space<vmem>>, vector<16x32xf32>
    %c0_9 = arith.constant 0 : index
    %c0_10 = arith.constant 0 : index
    %10 = vector.load %arg5[%c0_9, %c0_10] : memref<32x32xf32, #tpu.memory_space<vmem>>, vector<32x32xf32>
    %cst_11 = arith.constant dense<0.000000e+00> : vector<16x32xf32>
    %11 = tpu.matmul %9, %10, %cst_11 {dimension_numbers = #tpu.dot_dimension_numbers<[1], [0], [0], [1], [0, 0, 1, 1], [], []>} : vector<16x32xf32>, vector<32x32xf32>, vector<16x32xf32> -> vector<16x32xf32>
    %12 = vector.broadcast %2 : vector<1x32xf32> to vector<16x32xf32>
    %13 = arith.addf %11, %12 : vector<16x32xf32>
    %14 = vector.shape_cast %13 : vector<16x32xf32> to vector<2x8x32xf32>
    %c0_12 = arith.constant 0 : index
    %c0_13 = arith.constant 0 : index
    %15 = vector.load %arg3[%c0_12, %c0_13] : memref<2x32xf32, #tpu.memory_space<vmem>>, vector<2x32xf32>
    %c0_14 = arith.constant 0 : index
    %c0_15 = arith.constant 0 : index
    %16 = vector.load %arg6[%c0_14, %c0_15] : memref<32x32xf32, #tpu.memory_space<vmem>>, vector<32x32xf32>
    %cst_16 = arith.constant dense<0.000000e+00> : vector<2x32xf32>
    %17 = tpu.matmul %15, %16, %cst_16 {dimension_numbers = #tpu.dot_dimension_numbers<[1], [0], [0], [1], [0, 0, 1, 1], [], []>} : vector<2x32xf32>, vector<32x32xf32>, vector<2x32xf32> -> vector<2x32xf32>
    %18 = vector.broadcast %0 : vector<1x32xf32> to vector<2x32xf32>
    %19 = arith.addf %17, %18 : vector<2x32xf32>
    %20 = vector.shape_cast %19 : vector<2x32xf32> to vector<2x1x32xf32>
    %21 = vector.broadcast %20 : vector<2x1x32xf32> to vector<2x8x32xf32>
    %22 = arith.mulf %8, %21 : vector<2x8x32xf32>
    %23 = vector.shape_cast %22 : vector<2x8x32xf32> to vector<16x32xf32>
    %c0_17 = arith.constant 0 : index
    %c0_18 = arith.constant 0 : index
    %24 = vector.load %arg8[%c0_17, %c0_18] : memref<32x4xf32, #tpu.memory_space<vmem>>, vector<32x4xf32>
    %cst_19 = arith.constant dense<0.000000e+00> : vector<16x4xf32>
    %25 = tpu.matmul %23, %24, %cst_19 {dimension_numbers = #tpu.dot_dimension_numbers<[1], [0], [0], [1], [0, 0, 1, 1], [], []>} : vector<16x32xf32>, vector<32x4xf32>, vector<16x4xf32> -> vector<16x4xf32>
    %26 = vector.shape_cast %25 : vector<16x4xf32> to vector<2x8x4xf32>
    %cst_20 = arith.constant dense<0xFF800000> : vector<2x4xf32>
    %27 = vector.multi_reduction <maximumf>, %26, %cst_20 [1] : vector<2x8x4xf32> to vector<2x4xf32>
    %28 = vector.shape_cast %27 : vector<2x4xf32> to vector<2x1x4xf32>
    %29 = vector.broadcast %28 : vector<2x1x4xf32> to vector<2x8x4xf32>
    %30 = arith.subf %26, %29 : vector<2x8x4xf32>
    %31 = math.exp %30 : vector<2x8x4xf32>
    %cst_21 = arith.constant dense<0.000000e+00> : vector<2x4xf32>
    %32 = vector.multi_reduction <add>, %31, %cst_21 [1] : vector<2x8x4xf32> to vector<2x4xf32>
    %33 = vector.shape_cast %32 : vector<2x4xf32> to vector<2x1x4xf32>
    %34 = tpu.reciprocal %33 {approx = true} : vector<2x1x4xf32> -> vector<2x1x4xf32>
    %35 = arith.mulf %33, %34 : vector<2x1x4xf32>
    %cst_22 = arith.constant 2.000000e+00 : f32
    %36 = vector.broadcast %cst_22 : f32 to vector<2x1x4xf32>
    %37 = arith.subf %36, %35 : vector<2x1x4xf32>
    %38 = arith.mulf %34, %37 : vector<2x1x4xf32>
    %39 = vector.broadcast %38 : vector<2x1x4xf32> to vector<2x8x4xf32>
    %40 = arith.mulf %31, %39 : vector<2x8x4xf32>
    %41 = vector.shape_cast %40 : vector<2x8x4xf32> to vector<16x4xf32>
    %c0_23 = arith.constant 0 : index
    %c0_24 = arith.constant 0 : index
    %42 = vector.load %arg9[%c0_23, %c0_24] : memref<4x32xf32, #tpu.memory_space<vmem>>, vector<4x32xf32>
    %cst_25 = arith.constant dense<0.000000e+00> : vector<16x32xf32>
    %43 = tpu.matmul %41, %42, %cst_25 {dimension_numbers = #tpu.dot_dimension_numbers<[1], [0], [0], [1], [0, 0, 1, 1], [], []>} : vector<16x4xf32>, vector<4x32xf32>, vector<16x32xf32> -> vector<16x32xf32>
    %44 = vector.shape_cast %43 : vector<16x32xf32> to vector<2x8x32xf32>
    %45 = arith.mulf %44, %14 : vector<2x8x32xf32>
    %cst_26 = arith.constant dense<0.000000e+00> : vector<2x32xf32>
    %46 = vector.multi_reduction <add>, %45, %cst_26 [1] : vector<2x8x32xf32> to vector<2x32xf32>
    %c0_27 = arith.constant 0 : index
    %c0_28 = arith.constant 0 : index
    %47 = vector.load %arg10[%c0_27, %c0_28] : memref<32x32xf32, #tpu.memory_space<vmem>>, vector<32x32xf32>
    %cst_29 = arith.constant dense<0.000000e+00> : vector<2x32xf32>
    %48 = tpu.matmul %46, %47, %cst_29 {dimension_numbers = #tpu.dot_dimension_numbers<[1], [0], [0], [1], [0, 0, 1, 1], [], []>} : vector<2x32xf32>, vector<32x32xf32>, vector<2x32xf32> -> vector<2x32xf32>
    %c0_30 = arith.constant 0 : index
    %c0_31 = arith.constant 0 : index
    %49 = vector.load %arg11[%c0_30, %c0_31] : memref<1x32xf32, #tpu.memory_space<vmem>>, vector<1x32xf32>
    %50 = vector.broadcast %49 : vector<1x32xf32> to vector<2x32xf32>
    %51 = arith.addf %48, %50 : vector<2x32xf32>
    %c0_32 = arith.constant 0 : index
    %c0_33 = arith.constant 0 : index
    %52 = vector.load %arg12[%c0_32, %c0_33] : memref<2x32xf32, #tpu.memory_space<vmem>>, vector<2x32xf32>
    tpu.vector_store %arg12[%c0_32, %c0_33], %51 {strides = array<i32>} : memref<2x32xf32, #tpu.memory_space<vmem>>, vector<2x32xf32>,
    return
  }
  func.func @transform_0(%arg0: i32) -> (i32, i32) {
    %c0_i32 = arith.constant 0 : i32
    %c0_i32_0 = arith.constant 0 : i32
    %c0_i32_1 = arith.constant 0 : i32
    return %c0_i32, %c0_i32_0 : i32, i32
  }
  func.func @transform_1(%arg0: i32) -> (i32, i32) {
    %c0_i32 = arith.constant 0 : i32
    %c0_i32_0 = arith.constant 0 : i32
    %c0_i32_1 = arith.constant 0 : i32
    return %c0_i32, %c0_i32_0 : i32, i32
  }
  func.func @transform_2(%arg0: i32) -> (i32, i32) {
    %c0_i32 = arith.constant 0 : i32
    %c0_i32_0 = arith.constant 0 : i32
    %c0_i32_1 = arith.constant 0 : i32
    return %c0_i32, %c0_i32_0 : i32, i32
  }
  func.func @transform_3(%arg0: i32) -> (i32, i32) {
    %c0_i32 = arith.constant 0 : i32
    %c0_i32_0 = arith.constant 0 : i32
    %c0_i32_1 = arith.constant 0 : i32
    return %c0_i32, %c0_i32_0 : i32, i32
  }
  func.func @transform_4(%arg0: i32) -> (i32, i32) {
    %c0_i32 = arith.constant 0 : i32
    %c0_i32_0 = arith.constant 0 : i32
    %c0_i32_1 = arith.constant 0 : i32
    return %c0_i32, %c0_i32_0 : i32, i32
  }
  func.func @transform_5(%arg0: i32) -> (i32, i32) {
    %c0_i32 = arith.constant 0 : i32
    %c0_i32_0 = arith.constant 0 : i32
    %c0_i32_1 = arith.constant 0 : i32
    return %c0_i32, %c0_i32_0 : i32, i32
  }
  func.func @transform_6(%arg0: i32) -> (i32, i32) {
    %c0_i32 = arith.constant 0 : i32
    %c0_i32_0 = arith.constant 0 : i32
    %c0_i32_1 = arith.constant 0 : i32
    return %c0_i32, %c0_i32_0 : i32, i32
  }
  func.func @transform_7(%arg0: i32) -> (i32, i32) {
    %c0_i32 = arith.constant 0 : i32
    %c0_i32_0 = arith.constant 0 : i32
    %c0_i32_1 = arith.constant 0 : i32
    return %c0_i32, %c0_i32_0 : i32, i32
  }
  func.func @transform_8(%arg0: i32) -> (i32, i32) {
    %c0_i32 = arith.constant 0 : i32
    %c0_i32_0 = arith.constant 0 : i32
    %c0_i32_1 = arith.constant 0 : i32
    return %c0_i32, %c0_i32_0 : i32, i32
  }
  func.func @transform_9(%arg0: i32) -> (i32, i32) {
    %c0_i32 = arith.constant 0 : i32
    %c0_i32_0 = arith.constant 0 : i32
    %c0_i32_1 = arith.constant 0 : i32
    return %c0_i32, %c0_i32_0 : i32, i32
  }
  func.func @transform_10(%arg0: i32) -> (i32, i32) {
    %c0_i32 = arith.constant 0 : i32
    %c0_i32_0 = arith.constant 0 : i32
    %c0_i32_1 = arith.constant 0 : i32
    return %c0_i32, %c0_i32_0 : i32, i32
  }
  func.func @transform_11(%arg0: i32) -> (i32, i32) {
    %c0_i32 = arith.constant 0 : i32
    %c0_i32_0 = arith.constant 0 : i32
    %c0_i32_1 = arith.constant 0 : i32
    return %c0_i32, %c0_i32_0 : i32, i32
  }
}

</mosaic_0001>

<bundles_post_ra>
// kernel: tpu_custom_call.1
= control target key start
LH: loop header
LB: loop body
LE: loop exit
PB: predicated region body
PF: predicated region fallthrough
CT: control target
= control target key end

     0   :  { %16 = vsyncpa [#allocation3], 0  ;;  %s1339_s0 = inlined_call_operand.hbm [shape: f32[16,32], index: 0, kind: input, shape index: {}]   ;;  %s1340_s1 = inlined_call_operand.hbm [shape: f32[16,32], index: 1, kind: input, shape index: {}]   ;;  %s1341_s2 = inlined_call_operand.vmem [shape: f32[2,32], index: 2, kind: input, shape index: {}]   ;;  %s1342_s3 = inlined_call_operand.vmem [shape: f32[32,32], index: 3, kind: input, shape index: {}]   ;;  %s1343_s4 = inlined_call_operand.hbm [shape: f32[32,32], index: 4, kind: input, shape index: {}]   ;;  %s1344_s5 = inlined_call_operand.hbm [shape: f32[32,32], index: 5, kind: input, shape index: {}]   ;;  %s1345_s6 = inlined_call_operand.hbm [shape: f32[3,32], index: 6, kind: input, shape index: {}]   ;;  %s1346_s7 = inlined_call_operand.vmem [shape: f32[32,4], index: 7, kind: input, shape index: {}]   ;;  %s1347_s8 = inlined_call_operand.hbm [shape: f32[4,32], index: 8, kind: input, shape index: {}]   ;;  %s1348_s9 = inlined_call_operand.vmem [shape: f32[32,32], index: 9, kind: input, shape index: {}]   ;;  %s1349_s10 = inlined_call_operand.vmem [shape: f32[1,32], index: 10, kind: input, shape index: {}]   ;;  %s1350_s11 = inlined_call_operand.hbm [shape: f32[2,32], index: 11, kind: output, shape index: {}]  }
   0x1   :  { %17 = vsyncpa [#allocation6], 0 }
   0x2   :  { %18 = vsyncpa [#allocation9], 0 }
   0x3   :  { %19 = vsyncpa [#allocation12], 0 }
   0x4   :  { %20 = vsyncpa [#allocation4], 0  ;;  %s1086_s17 = smov [#allocation5]   ;;  %s1087_s19 = smov [#allocation8]  }
   0x5   :  { %s38_s18 = sshll.u32 %s1086_s17, 4  ;;  %s66_s20 = sshll.u32 %s1087_s19, 4  ;;  %s39_s18 = int_to_ptr.vmem [resolvable:$true] %s38_s18  ;;  %s1159_s20 = int_to_ptr.vmem [resolvable:$true] %s66_s20 }
   0x6   :  { %s922_s23 = scalar_lea.hbm %s1340_s1, 256 }
   0x7   :  { %p923_p0 = scmp.ne.s32.totalorder %s1340_s1, %s922_s23  ;;  %p926_p1 = scmp.lt.u32.totalorder %s922_s23, %s1340_s1 }
   0x9   :  { %p928_p2 = pnand %p926_p1, %p923_p0 }
   0xb   :  { %931 = shalt.err (!%p928_p2)
}
   0xc   :  { %s932_s28 = scalar_lea.vmem %s39_s18, 256  ;;  %p937_p4 = scmp.lt.s32.totalorder %s39_s18, %s39_s18 }
   0xd   :  { %p933_p3 = scmp.ne.s32.totalorder %s39_s18, %s932_s28  ;;  %p938_p5 = scmp.lt.s32.totalorder %s932_s28, %s932_s28 }
   0xf   :  { %p939_p6 = por %p938_p5, %p937_p4 }
  0x11   :  { %p940_p7 = pnand %p939_p6, %p933_p3 }
  0x13   :  { %943 = shalt.err (!%p940_p7)
}
  0x14   :  { %s1088_s29 = smov 128   ;;  %s1089_s30 = smov 8  }
  0x15   :  { %44 = dma.hbm_to_vmem [thread:$0]  %s1340_s1, 256, %s39_s18, [#allocation6], %s1088_s29, %s1088_s29, %s1089_s30  }
  0x16   :  { %s944_s16 = scalar_lea.hbm %s1344_s5, 512 }
  0x17   :  { %p945_p8 = scmp.ne.s32.totalorder %s1344_s5, %s944_s16  ;;  %p948_p9 = scmp.lt.u32.totalorder %s944_s16, %s1344_s5 }
  0x19   :  { %p950_p10 = pnand %p948_p9, %p945_p8 }
  0x1b   :  { %953 = shalt.err (!%p950_p10)
}
  0x1c   :  { %s954_s23 = scalar_lea.vmem %s1159_s20, 512  ;;  %p959_p12 = scmp.lt.s32.totalorder %s1159_s20, %s1159_s20 }
  0x1d   :  { %p955_p11 = scmp.ne.s32.totalorder %s1159_s20, %s954_s23  ;;  %p960_p13 = scmp.lt.s32.totalorder %s954_s23, %s954_s23 }
  0x1f   :  { %p961_p0 = por %p960_p13, %p959_p12 }
  0x21   :  { %p962_p1 = pnand %p961_p0, %p955_p11 }
  0x23   :  { %965 = shalt.err (!%p962_p1)
}
  0x24   :  { %72 = dma.hbm_to_vmem [thread:$0]  %s1344_s5, 512, %s1159_s20, [#allocation9], %s1088_s29, %s1088_s29, %s1089_s30  }
  0x25   :  { %s1090_s24 = smov [#allocation2]   ;;  %s1091_s26 = smov [#allocation7]  }
  0x26   :  { %s26_s25 = sshll.u32 %s1090_s24, 4  ;;  %s54_s27 = sshll.u32 %s1091_s26, 4  ;;  %s27_s25 = int_to_ptr.vmem [resolvable:$true] %s26_s25  ;;  %s1196_s27 = int_to_ptr.vmem [resolvable:$true] %s54_s27 }
  0x27   :  { %s966_s13 = scalar_lea.hbm %s1339_s0, 256 }
  0x28   :  { %p967_p2 = scmp.ne.s32.totalorder %s1339_s0, %s966_s13  ;;  %p970_p3 = scmp.lt.u32.totalorder %s966_s13, %s1339_s0 }
  0x2a   :  { %p972_p4 = pnand %p970_p3, %p967_p2 }
  0x2c   :  { %975 = shalt.err (!%p972_p4)
}
  0x2d   :  { %s976_s5 = scalar_lea.vmem %s27_s25, 256  ;;  %p981_p6 = scmp.lt.s32.totalorder %s27_s25, %s27_s25 }
  0x2e   :  { %p977_p5 = scmp.ne.s32.totalorder %s27_s25, %s976_s5  ;;  %p982_p7 = scmp.lt.s32.totalorder %s976_s5, %s976_s5 }
  0x30   :  { %p983_p8 = por %p982_p7, %p981_p6 }
  0x32   :  { %p984_p9 = pnand %p983_p8, %p977_p5 }
  0x34   :  { %987 = shalt.err (!%p984_p9)
}
  0x35   :  { %32 = dma.hbm_to_vmem [thread:$0]  %s1339_s0, 256, %s27_s25, [#allocation3], %s1088_s29, %s1088_s29, %s1089_s30  }
  0x36   :  { %s988_s23 = scalar_lea.hbm %s1343_s4, 512 }
  0x37   :  { %p989_p10 = scmp.ne.s32.totalorder %s1343_s4, %s988_s23  ;;  %p992_p11 = scmp.lt.u32.totalorder %s988_s23, %s1343_s4 }
  0x39   :  { %p994_p12 = pnand %p992_p11, %p989_p10 }
  0x3b   :  { %997 = shalt.err (!%p994_p12)
}
  0x3c   :  { %s998_s28 = scalar_lea.vmem %s1196_s27, 512  ;;  %p1003_p0 = scmp.lt.s32.totalorder %s1196_s27, %s1196_s27 }
  0x3d   :  { %p999_p13 = scmp.ne.s32.totalorder %s1196_s27, %s998_s28  ;;  %p1004_p1 = scmp.lt.s32.totalorder %s998_s28, %s998_s28 }
  0x3f   :  { %p1005_p2 = por %p1004_p1, %p1003_p0 }
  0x41   :  { %p1006_p3 = pnand %p1005_p2, %p999_p13 }
  0x43   :  { %1009 = shalt.err (!%p1006_p3)
}
  0x44   :  { %60 = dma.hbm_to_vmem [thread:$0]  %s1343_s4, 512, %s1196_s27, [#allocation6], %s1088_s29, %s1088_s29, %s1089_s30  }
  0x45   :  { %s1092_s12 = smov [#allocation10]   ;;  %s1093_s14 = smov [#allocation11]  }
  0x46   :  { %s79_s13 = sshll.u32 %s1092_s12, 4  ;;  %s91_s15 = sshll.u32 %s1093_s14, 4  ;;  %s80_s13 = int_to_ptr.vmem [resolvable:$true] %s79_s13  ;;  %s92_s15 = int_to_ptr.vmem [resolvable:$true] %s91_s15 }
  0x47   :  { %s1010_s5 = scalar_lea.hbm %s1345_s6, 64 }
  0x48   :  { %p1011_p4 = scmp.ne.s32.totalorder %s1345_s6, %s1010_s5  ;;  %p1014_p5 = scmp.lt.u32.totalorder %s1010_s5, %s1345_s6 }
  0x4a   :  { %p1016_p6 = pnand %p1014_p5, %p1011_p4 }
  0x4c   :  { %1019 = shalt.err (!%p1016_p6)
}
  0x4d   :  { %s1020_s4 = scalar_lea.vmem %s80_s13, 64  ;;  %p1025_p8 = scmp.lt.s32.totalorder %s80_s13, %s80_s13 }
  0x4e   :  { %p1021_p7 = scmp.ne.s32.totalorder %s80_s13, %s1020_s4  ;;  %p1026_p9 = scmp.lt.s32.totalorder %s1020_s4, %s1020_s4 }
  0x50   :  { %p1027_p10 = por %p1026_p9, %p1025_p8 }
  0x52   :  { %p1028_p11 = pnand %p1027_p10, %p1021_p7 }
  0x54   :  { %1031 = shalt.err (!%p1028_p11)
}
  0x55   :  { %82 = dma.hbm_to_vmem [thread:$0]  %s1345_s6, 64, %s80_s13, [#allocation9]  }
  0x56   :  { %s1032_s1 = scalar_lea.hbm %s1347_s8, 64 }
  0x57   :  { %p1033_p12 = scmp.ne.s32.totalorder %s1347_s8, %s1032_s1  ;;  %p1036_p13 = scmp.lt.u32.totalorder %s1032_s1, %s1347_s8 }
  0x59   :  { %p1038_p0 = pnand %p1036_p13, %p1033_p12 }
  0x5b   :  { %1041 = shalt.err (!%p1038_p0)
}
  0x5c   :  { %s1042_s0 = scalar_lea.vmem %s92_s15, 64  ;;  %p1047_p2 = scmp.lt.s32.totalorder %s92_s15, %s92_s15 }
  0x5d   :  { %p1043_p1 = scmp.ne.s32.totalorder %s92_s15, %s1042_s0  ;;  %p1048_p3 = scmp.lt.s32.totalorder %s1042_s0, %s1042_s0 }
  0x5f   :  { %p1049_p4 = por %p1048_p3, %p1047_p2 }
  0x61   :  { %p1050_p5 = pnand %p1049_p4, %p1043_p1 }
  0x63   :  { %1053 = shalt.err (!%p1050_p5)
}
  0x64   :  { %94 = dma.hbm_to_vmem [thread:$0]  %s1347_s8, 64, %s92_s15, [#allocation12]  }
  0x65   :  { %1076 = dma.done.wait [#allocation3], 256  }
  0x66   :  { %1077 = vsyncadd [#allocation3], 4294967040 }
  0x67   :  { %1078 = dma.done.wait [#allocation6], 768  }
  0x68   :  { %1079 = vsyncadd [#allocation6], 4294966528 }
  0x69   :  { %1080 = dma.done.wait [#allocation9], 576  }
  0x6a   :  { %1081 = vsyncadd [#allocation9], 4294966720 }
  0x6b   :  { %1082 = dma.done.wait [#allocation12], 64  }
  0x6c   :  { %1083 = vsyncadd [#allocation12], 4294967232  ;;  %vm130_vm0 = vcmask 261120   ;;  %v122_v0 = vld [vmem:[%s1342_s3] sm:$0xff]  ;;  %v123_v1 = vld [vmem:[%s1342_s3 + $0x8] sm:$0xff]  ;;  %v1094_v11 = vmov 0.0|0.0   ;;  %v389_v33 = vlaneseq }
  0x6d   :  { %v124_v2 = vld [vmem:[%s1342_s3 + $0x10] sm:$0xff]  ;;  %v865_v3 = vpack.c.bf16 %v123_v1, %v122_v0  ;;  %v125_v4 = vld [vmem:[%s1342_s3 + $0x18] sm:$0xff]  ;;  %v120_v5 = vld [vmem:[#allocation2] sm:$0xff]  ;;  %vm1095_vm1 = vmmov 0   ;;  %v1096_v15 = vmov 0.0   ;;  %vm557_vm2 = vcmask 1043456  }
  0x6e   :  { %v869_v6 = vpack.c.bf16 %v125_v4, %v124_v2  ;;  %813 = vmatprep.mubr.msk.f32.mxu0 %vm130_vm0, %v120_v5  ;;  %v304_v7 = vld [vmem:[#allocation8] sm:$0xff]  ;;  %v305_v8 = vld [vmem:[#allocation8 + $0x8] sm:$0xff]  ;;  %v306_v12 = vld [vmem:[#allocation8 + $0x10] sm:$0xff]  ;;  %v1097_v31 = vmov 1966171168   ;;  %v390_v37 = vshrl.u32 %v389_v33, 7 }
  0x6f   :  { %866 = vmatprep.subr.bf16.mxu0 %v865_v3  ;;  %v121_v9 = vld [vmem:[#allocation2 + $0x8] sm:$0xff]  ;;  %v882_v10 = vpack.c.bf16 %v305_v8, %v304_v7  ;;  %v307_v13 = vld [vmem:[#allocation8 + $0x18] sm:$0xff]  ;;  %v303_v16 = vld [vmem:[%s1341_s2] sm:$0x3]  ;;  %v387_v32 = vunpack.c.l.s4 %v1097_v31  ;;  %vm505_vm3 = vcmask 31744   ;;  %vm665_vm4 = vcmask 1041409  }
  0x70   :  { %868 = vmatpush3.bf16.msra.mxu0 %v865_v3  ;;  %v885_v14 = vpack.c.bf16 %v307_v13, %v306_v12  ;;  %v214_v17 = vld [vmem:[#allocation7] sm:$0xff]  ;;  %v215_v18 = vld [vmem:[#allocation7 + $0x8] sm:$0xff]  ;;  %v216_v20 = vld [vmem:[#allocation7 + $0x10] sm:$0xff]  ;;  %v410_v44 = vsub.s32 0, %v390_v37  ;;  %s1098_s25 = smov [#allocation13]   ;;  %vm739_vm5 = vcmask 254976  }
  0x71   :  { %870 = vmatprep.subr.bf16.mxu0 %v869_v6  ;;  %v873_v19 = vpack.c.bf16 %v215_v18, %v214_v17  ;;  %v217_v21 = vld [vmem:[#allocation7 + $0x18] sm:$0xff]  ;;  %v420_v23 = vld [vmem:[%s1346_s7] sm:$0xff]  ;;  %v421_v24 = vld [vmem:[%s1346_s7 + $0x8] sm:$0xff]  ;;  %v388_v36 = vunpack.c.0.s8 %v387_v32  ;;  %s747_s12 = sshll.u32 %s1098_s25, 4  ;;  %s748_s12 = int_to_ptr.vmem [resolvable:$true] %s747_s12 }
  0x72   :  { %v877_v22 = vpack.c.bf16 %v217_v21, %v216_v20  ;;  %v212_v25 = vld [vmem:[#allocation5] sm:$0xff]  ;;  %v887_v26 = vpack.c.bf16 %v421_v24, %v420_v23  ;;  %v213_v27 = vld [vmem:[#allocation5 + $0x8] sm:$0xff]  ;;  %v765_v38 = vld [vmem:[#allocation10] ss:$0 sm:$0xff]  ;;  %s1054_s13 = scalar_lea.vmem %s748_s12, 32  ;;  %p1059_p7 = scmp.lt.s32.totalorder %s748_s12, %s748_s12 }
  0x73   :  { %874 = vmatprep.subr.bf16.mxu1 %v873_v19  ;;  %824 = vmatprep.mubr.msk.f32.mxu1 %vm130_vm0, %v212_v25  ;;  %v422_v28 = vld [vmem:[%s1346_s7 + $0x10] sm:$0xff]  ;;  %v423_v29 = vld [vmem:[%s1346_s7 + $0x18] sm:$0xff]  ;;  %v391_v39 = vsub.s32 %v388_v36, %v390_v37  ;;  %v759_v45 = vld [vmem:[#allocation10 + $0x1] ss:$0 sm:$0xff]  ;;  %p1055_p6 = scmp.ne.s32.totalorder %s748_s12, %s1054_s13  ;;  %p1060_p8 = scmp.lt.s32.totalorder %s1054_s13, %s1054_s13 }
  0x74   :  { %872 = vmatpush3.bf16.msra.mxu0 %v869_v6  ;;  %876 = vmatpush3.bf16.msra.mxu1 %v873_v19  ;;  %v891_v30 = vpack.c.bf16 %v423_v29, %v422_v28  ;;  %v550_v57 = vld [vmem:[#allocation11] sm:$0xf] }
  0x75   :  { %881 = vmatprep.subr.bf16.mxu0 %v1094_v11  ;;  %878 = vmatprep.subr.bf16.mxu1 %v877_v22  ;;  %p1061_p9 = por %p1060_p8, %p1059_p7 }
  0x77   :  { %814 = vmatmul.mubr.msk.f32.vlgmr.msra.gmra.mrb[0].mxu0 %vm130_vm0, %v121_v9  ;;  %p1062_p10 = pnand %p1061_p9, %p1055_p6 }
  0x78   :  { %883 = vmatpush3.bf16.msra.mxu0 %v882_v10  ;;  %835 = vmatprep.mubr.msk.f32.mxu0 %vm1095_vm1, %v1096_v15 }
  0x79   :  { %884 = vmatprep.subr.bf16.mxu0 %v1094_v11  ;;  %880 = vmatpush3.bf16.msra.mxu1 %v877_v22 }
  0x7a   :  { %888 = vmatprep.subr.bf16.mxu1 %v887_v26 }
  0x7c   :  { %886 = vmatpush3.bf16.msra.mxu0 %v885_v14  ;;  %825 = vmatmul.mubr.msk.f32.vlgmr.msra.gmra.mrb[0].mxu1 %vm130_vm0, %v213_v27 }
  0x7d   :  { %890 = vmatpush3.bf16.msra.mxu1 %v887_v26  ;;  %849 = vmatprep.subr.msk.mxu0 %vm557_vm2, %v550_v57 }
  0x7e   :  { %892 = vmatprep.subr.bf16.mxu1 %v891_v30 }
  0x7f   :  { %836 = vmatmul.mubr.msk.f32.vlgmr.msra.gmra.mrb[2].mxu0 %vm130_vm0, %v303_v16 }
  0x80   :  { %850 = vmatpush3.msk.msra.mxu0 %vm557_vm2, %v550_v57 }
  0x81   :  { %894 = vmatpush3.bf16.msra.mxu1 %v891_v30 }
  0x82   :  { %895 = vmatprep.subr.bf16.mxu1 %v1094_v11 }
 0x14a   :  { %v815_v34 = vpop.f32.mrb[0].mxu0 }
 0x14b   :  { %v203_v35 = vpop.f32.mrb[1].mxu0  ;;  %v209_v51 = vadd.f32 %v815_v34, %v759_v45 }
 0x14c   :  { %v204_v48 = vadd.f32 %v759_v45, %v203_v35  ;;  %v655_v45 = vld [vmem:[%s1348_s9 + $0x18] sm:$0xff] }
 0x14f   :  { %v1296_v55 = vpop.f32.mrb[0].mxu1 }
 0x150   :  { %v1298_v56 = vpop.f32.mrb[1].mxu1 }
 0x152   :  { %v381_v40 = vpop.f32.mrb[2].mxu0 }
 0x153   :  { %v382_v41 = vadd.f32 %v765_v38, %v381_v40  ;;  %v837_v42 = vpop.f32.mrb[3].mxu0 }
 0x154   :  { %v653_v42 = vld [vmem:[%s1348_s9 + $0x8] sm:$0xff] }
 0x155   :  { %v392_v43 = vrot.slane %v382_v41, %v391_v39  ;;  %v652_v41 = vld [vmem:[%s1348_s9] sm:$0xff] }
 0x157   :  { %v393_v46 = vcombine.high %v392_v43, %v392_v43  ;;  %v400_v47 = vrot.slane %v392_v43, %v391_v39  ;;  %v896_v43 = vpack.c.bf16 %v653_v42, %v652_v41 }
 0x159   :  { %v407_v49 = vrot.slane %v393_v46, %v391_v39  ;;  %v411_v50 = vrot.slane %v400_v47, %v410_v44  ;;  %v762_v47 = vld [vmem:[#allocation10 + $0x2] ss:$0 sm:$0xff] }
 0x15b   :  { %v415_v52 = vrot.slane %v407_v49, %v410_v44  ;;  %v418_v53 = vmul.f32 %v411_v50, %v204_v48  ;;  %v654_v44 = vld [vmem:[%s1348_s9 + $0x10] sm:$0xff]  ;;  %v300_v48 = vadd.f32 %v1296_v55, %v762_v47  ;;  %v295_v49 = vadd.f32 %v762_v47, %v1298_v56 }
 0x15c   :  { %v899_v46 = vpack.c.bf16 %v655_v45, %v654_v44 }
 0x15d   :  { %v419_v54 = vmul.f32 %v415_v52, %v209_v51  ;;  %846 = vmatprep.mubr.msk.f32.mxu1 %vm130_vm0, %v418_v53 }
 0x15f   :  { %847 = vmatmul.mubr.msk.f32.vlgmr.msra.gmra.mrb[2].mxu1 %vm130_vm0, %v419_v54 }
 0x160   :  { %862 = vmatprep.mubr.msk.f32.mxu1 %vm1095_vm1, %v1096_v15  ;;  %897 = vmatpush3.bf16.msra.mxu1 %v896_v43 }
 0x161   :  { %898 = vmatprep.subr.bf16.mxu1 %v1094_v11 }
 0x164   :  { %900 = vmatpush3.bf16.msra.mxu1 %v899_v46 }
 0x232   :  { %v848_v58 = vpop.f32.mrb[2].mxu1 }
 0x233   :  { %v513_v59 = vsel %vm505_vm3, %v848_v58, -inf  ;;  %v496_v60 = vpop.f32.mrb[3].mxu1 }
 0x234   :  { %v514_v61 = vrot.slane %v513_v59, 4  ;;  %v506_v62 = vsel %vm505_vm3, %v496_v60, -inf }
 0x235   :  { %v507_v63 = vrot.slane %v506_v62, 4 }
 0x236   :  { %v515_v0 = vmax.f32 %v513_v59, %v514_v61 }
 0x237   :  { %v508_v1 = vmax.f32 %v506_v62, %v507_v63 }
 0x238   :  { %v516_v2 = vrot.slane %v515_v0, 2 }
 0x239   :  { %v509_v3 = vrot.slane %v508_v1, 2 }
 0x23a   :  { %v517_v4 = vmax.f32 %v515_v0, %v516_v2 }
 0x23b   :  { %v510_v5 = vmax.f32 %v508_v1, %v509_v3 }
 0x23c   :  { %v518_v6 = vrot.slane %v517_v4, 1 }
 0x23d   :  { %v511_v7 = vrot.slane %v510_v5, 1 }
 0x23e   :  { %v519_v8 = vmax.f32 %v517_v4, %v518_v6  ;;  %v772_v4 = vld [vmem:[%s1349_s10] ss:$0 sm:$0xff] }
 0x23f   :  { %v512_v9 = vmax.f32 %v510_v5, %v511_v7 }
 0x240   :  { %v521_v10 = vsub.f32 %v848_v58, %v519_v8 }
 0x241   :  { %v520_v12 = vsub.f32 %v496_v60, %v512_v9 }
 0x242   :  { %v524_v13 = vmul.f32 1.442695, %v521_v10 }
 0x243   :  { %v522_v14 = vmul.f32 1.442695, %v520_v12 }
 0x244   :  { %914 = vpow2.f32 %v524_v13 }
 0x245   :  { %916 = vpow2.f32 %v522_v14 }
 0x24e   :  { %v915_v15 = vpop.eup %914 }
 0x24f   :  { %v917_v16 = vpop.eup %916  ;;  %v533_v17 = vsel %vm505_vm3, %v915_v15, 0.0 }
 0x250   :  { %v534_v18 = vrot.slane %v533_v17, 4  ;;  %v526_v19 = vsel %vm505_vm3, %v917_v16, 0.0 }
 0x251   :  { %v527_v20 = vrot.slane %v526_v19, 4 }
 0x252   :  { %v535_v21 = vadd.f32 %v534_v18, %v533_v17 }
 0x253   :  { %v528_v22 = vadd.f32 %v527_v20, %v526_v19 }
 0x254   :  { %v536_v23 = vrot.slane %v535_v21, 2 }
 0x255   :  { %v529_v24 = vrot.slane %v528_v22, 2 }
 0x256   :  { %v537_v25 = vadd.f32 %v536_v23, %v535_v21 }
 0x257   :  { %v530_v26 = vadd.f32 %v529_v24, %v528_v22 }
 0x258   :  { %v538_v27 = vrot.slane %v537_v25, 1 }
 0x259   :  { %v531_v28 = vrot.slane %v530_v26, 1 }
 0x25a   :  { %v539_v29 = vadd.f32 %v538_v27, %v537_v25 }
 0x25b   :  { %v532_v30 = vadd.f32 %v531_v28, %v530_v26 }
 0x25c   :  { %918 = vrcp.f32 %v539_v29 }
 0x25d   :  { %920 = vrcp.f32 %v532_v30 }
 0x266   :  { %v919_v31 = vpop.eup %918 }
 0x267   :  { %v921_v32 = vpop.eup %920  ;;  %v543_v33 = vmul.f32 %v919_v31, %v539_v29 }
 0x268   :  { %v542_v34 = vmul.f32 %v921_v32, %v532_v30 }
 0x269   :  { %v545_v35 = vsub.f32 2.0, %v543_v33 }
 0x26a   :  { %v544_v36 = vsub.f32 2.0, %v542_v34 }
 0x26b   :  { %v547_v37 = vmul.f32 %v919_v31, %v545_v35 }
 0x26c   :  { %v546_v38 = vmul.f32 %v921_v32, %v544_v36 }
 0x26d   :  { %v549_v40 = vmul.f32 %v915_v15, %v547_v37 }
 0x26e   :  { %v548_v39 = vmul.f32 %v917_v16, %v546_v38 }
 0x270   :  { %851 = vmatprep.mubr.msk.f32.mxu0 %vm505_vm3, %v548_v39 }
 0x271   :  { %852 = vmatmul.mubr.msk.f32.vlgmr.msra.gmra.mrb[4].mxu0 %vm505_vm3, %v549_v40 }
 0x344   :  { %v853_v50 = vpop.f32.mrb[4].mxu0 }
 0x345   :  { %v637_v51 = vmul.f32 %v853_v50, %v300_v48  ;;  %v627_v52 = vpop.f32.mrb[5].mxu0 }
 0x346   :  { %v636_v53 = vmul.f32 %v627_v52, %v295_v49 }
 0x347   :  { %v645_v11 = vsel %vm130_vm0, %v637_v51, 0.0 }
 0x348   :  { %v646_v54 = vrot.slane %v645_v11, 4  ;;  %v638_v57 = vsel %vm130_vm0, %v636_v53, 0.0 }
 0x349   :  { %v639_v58 = vrot.slane %v638_v57, 4 }
 0x34a   :  { %v647_v59 = vadd.f32 %v646_v54, %v645_v11 }
 0x34b   :  { %v640_v60 = vadd.f32 %v639_v58, %v638_v57 }
 0x34c   :  { %v648_v61 = vrot.slane %v647_v59, 2 }
 0x34d   :  { %v641_v62 = vrot.slane %v640_v60, 2 }
 0x34e   :  { %v649_v63 = vadd.f32 %v648_v61, %v647_v59 }
 0x34f   :  { %v642_v0 = vadd.f32 %v641_v62, %v640_v60 }
 0x350   :  { %v650_v1 = vrot.slane %v649_v63, 1 }
 0x351   :  { %v643_v55 = vrot.slane %v642_v0, 1 }
 0x352   :  { %v651_v2 = vadd.f32 %v650_v1, %v649_v63 }
 0x353   :  { %v644_v56 = vadd.f32 %v643_v55, %v642_v0 }
 0x355   :  { %v666_v3 = vsel %vm665_vm4, %v651_v2, %v644_v56 }
 0x356   :  { %863 = vmatmul.mubr.msk.f32.vlgmr.msra.gmra.mrb[4].mxu1 %vm130_vm0, %v666_v3 }
 0x429   :  { %v735_v5 = vpop.f32.mrb[4].mxu1 }
 0x42a   :  { %v736_v6 = vadd.f32 %v772_v4, %v735_v5  ;;  %v864_v7 = vpop.f32.mrb[5].mxu1 }
 0x42c   :  { %740 = vst.msk [vmem:[#allocation13] sm:$0x3] %vm739_vm5, %v736_v6 }
 0x42d   :  { %1065 = shalt.err (!%p1062_p10)
}
 0x42e   :  { %s1066_s17 = scalar_lea.hbm %s1350_s11, 32 }
 0x42f   :  { %p1067_p11 = scmp.ne.s32.totalorder %s1350_s11, %s1066_s17  ;;  %p1070_p12 = scmp.lt.u32.totalorder %s1066_s17, %s1350_s11 }
 0x431   :  { %p1072_p13 = pnand %p1070_p12, %p1067_p11 }
 0x433   :  { %1075 = shalt.err (!%p1072_p13)
}
 0x434   :  { %750 = dma.vmem_to_hbm [thread:$0]  %s748_s12, 32, %s1350_s11, [#allocation4]  }
 0x435   :  { %1084 = dma.done.wait [#allocation4], 32  }
 0x436   :  { %1085 = vsyncadd [#allocation4], 4294967264 }
 0x437   :  { %754 = vsyncpa [#allocation3], 1 }
 0x438   :  { %755 = vsyncpa [#allocation6], 1 }
 0x439   :  { %756 = vsyncpa [#allocation9], 1 }
 0x43a   :  { %757 = vsyncpa [#allocation12], 1 }
 0x43b   :  { %758 = vsyncpa [#allocation4], 1 }

</bundles_post_ra>
